<compile_context>
chip_gen: v7x
topology: tpu7x:2x2x1
jax: 0.10.0
libtpu: 0.0.40
codegen_flags: <defaults>
</compile_context>

<pallas_src>
import functools
import math

import jax
import jax.numpy as jnp
from jax.experimental import pallas as pl
from jax.experimental.pallas import tpu as pltpu


def _round_up(x, m):
    return (x + m - 1) // m * m


def _refined_reciprocal(d):
    """EUP approximate reciprocal + one Newton step (~full f32 accuracy)."""
    inv0 = pl.reciprocal(d, approx=True)
    return inv0 * (2.0 - d * inv0)


def dqp_kernel(x_ref, w_ref, b_ref, out_ref, *, d2):
    """Fused forward for one batch tile: y = x @ [Wr|Wd] + [br|bd], then
    L2-normalize each quaternion group of the real half, single full store."""
    x = x_ref[...]                                                   # (bm, in_dim)
    y = jnp.dot(x, w_ref[...],
                preferred_element_type=jnp.float32) + b_ref[...]     # (bm, out_dim)

    bm, out_dim = y.shape
    col = jax.lax.broadcasted_iota(jnp.int32, (bm, out_dim), 1)
    is_real = col < d2

    if d2 == 4:
        # Exactly-PyTorch-valid config: one quaternion group in the real half.
        # Masked lane reduce over the real columns (no reshape, no slices).
        ss = jnp.sum(jnp.where(is_real, y * y, 0.0),
                     axis=-1, keepdims=True)                         # (bm, 1)
        inv = _refined_reciprocal(jnp.sqrt(ss) + 1e-8)
        scale = jnp.where(is_real, inv, 1.0)                         # (bm, out_dim)
        out_ref[...] = (y * scale).astype(out_ref.dtype)
    else:
        # Generalized: normalize every consecutive group of 4 real features.
        ng = out_dim // 4
        y3 = y.reshape(bm, ng, 4)
        ss = jnp.sum(y3 * y3, axis=-1, keepdims=True)                # (bm, ng, 1)
        inv = _refined_reciprocal(jnp.sqrt(ss) + 1e-8)
        grp = jax.lax.broadcasted_iota(jnp.int32, ss.shape, 1)
        scale3 = jnp.where(grp < d2 // 4, inv, 1.0)                  # dual groups pass through
        out_ref[...] = (y3 * scale3).reshape(bm, out_dim).astype(out_ref.dtype)


def _pick_block_m(B, in_dim, out_dim, vmem_budget_bytes=32 * 1024 * 1024):
    """Largest batch tile (multiple of 8, capped at 512) fitting a conservative
    VMEM budget (sized for v7x's smaller VMEM), with >=2 grid steps when the
    batch allows so v7x's two TensorCores can both be used."""
    resident = 4 * (in_dim * out_dim + 8 * 128)            # fused W + padded bias row
    per_row = 4 * 2 * (in_dim + out_dim)                   # double-buffered x + out tiles
    fit_rows = max(8, ((vmem_budget_bytes - resident) // per_row) // 8 * 8)
    bm = min(512, _round_up(B, 8), fit_rows)
    if B >= 16:
        bm = min(bm, _round_up(pl.cdiv(B, 2), 8))          # keep >= 2 grid steps
    return max(8, bm)


def dual_quaternion_projection(x, w_real, b_real, w_dual, b_dual, *, block_m=None):
    """x: (B, input_dim) f32; w_*: (input_dim, output_dim//2); b_*: (output_dim//2,)."""
    B, in_dim = x.shape
    d2 = w_real.shape[1]
    out_dim = 2 * d2
    assert out_dim % 8 == 0, "output_dim must be divisible by 8"

    # Host-side one-time fusion of the two linears into one lane-dense matmul.
    w = jnp.concatenate([w_real, w_dual], axis=1)                 # (in_dim, out_dim)
    b = jnp.concatenate([b_real, b_dual]).reshape(1, out_dim)     # (1, out_dim)

    if block_m is None:
        block_m = _pick_block_m(B, in_dim, out_dim)
    B_pad = _round_up(B, block_m)
    if B_pad != B:
        x = jnp.pad(x, ((0, B_pad - B), (0, 0)))                  # masked tail via zero-pad

    grid = (B_pad // block_m,)
    cost = pl.CostEstimate(
        flops=2 * B_pad * in_dim * out_dim,
        transcendentals=B_pad * max(out_dim // 4, 1),
        bytes_accessed=4 * (B_pad * in_dim + in_dim * out_dim + out_dim
                            + B_pad * out_dim),
    )

    out = pl.pallas_call(
        functools.partial(dqp_kernel, d2=d2),
        out_shape=jax.ShapeDtypeStruct((B_pad, out_dim), jnp.float32),
        grid=grid,
        in_specs=[
            pl.BlockSpec((block_m, in_dim), lambda i: (i, 0)),    # x tile over batch
            pl.BlockSpec((in_dim, out_dim), lambda i: (0, 0)),    # fused W (resident)
            pl.BlockSpec((1, out_dim), lambda i: (0, 0)),         # fused bias
        ],
        out_specs=pl.BlockSpec((block_m, out_dim), lambda i: (i, 0)),
        compiler_params=pltpu.CompilerParams(
            dimension_semantics=("parallel",)),
        cost_estimate=cost,
    )(x, w, b)
    return out[:B]


def reference_forward(x, w_real, b_real, w_dual, b_dual):
    """Pure-JAX replica of the PyTorch forward (valid config: output_dim == 8)."""
    real = x @ w_real + b_real
    dual = x @ w_dual + b_dual
    d2 = real.shape[-1]
    r = real.reshape(-1, d2 // 4, 4)
    norm = jnp.linalg.norm(r, axis=-1, keepdims=True)
    r = r / (norm + 1e-8)
    real = r.reshape(-1, r.shape[-1])            # exactly mirrors view(-1, size(-1))
    return jnp.concatenate([real, dual], axis=-1)


def init_params(key, input_dim, output_dim):
    """Deterministic init mimicking torch.nn.Linear default (uniform +-1/sqrt(fan_in))."""
    d2 = output_dim // 2
    bound = 1.0 / math.sqrt(input_dim)
    k1, k2, k3, k4 = jax.random.split(key, 4)
    w_real = jax.random.uniform(k1, (input_dim, d2), jnp.float32, -bound, bound)
    b_real = jax.random.uniform(k2, (d2,), jnp.float32, -bound, bound)
    w_dual = jax.random.uniform(k3, (input_dim, d2), jnp.float32, -bound, bound)
    b_dual = jax.random.uniform(k4, (d2,), jnp.float32, -bound, bound)
    return w_real, b_real, w_dual, b_dual


if __name__ == "__main__":
    key = jax.random.PRNGKey(0)
    k_x, k_p = jax.random.split(key)

    # output_dim=8: the exactly-valid PyTorch config.  batch=24 exercises the
    # non-divisible-batch (pad + slice) path and a 2-step parallel grid.
    batch, input_dim, output_dim = 24, 32, 8
    x = jax.random.normal(k_x, (batch, input_dim), jnp.float32)
    w_real, b_real, w_dual, b_dual = init_params(k_p, input_dim, output_dim)

    out = dual_quaternion_projection(x, w_real, b_real, w_dual, b_dual)
    out = jax.block_until_ready(out)

    ref = reference_forward(x, w_real, b_real, w_dual, b_dual)
    assert out.shape == (batch, output_dim), out.shape
    assert jnp.allclose(out, ref, atol=1e-5, rtol=1e-5), "mismatch vs reference"

    print("KERNEL_OK")
</pallas_src>

<mosaic_0001>
module attributes {stable_mosaic.version = 11 : i64} {
  func.func @dqp_kernel(%arg0: i32, %arg1: memref<16x32xf32, #tpu.memory_space<vmem>>, %arg2: memref<32x8xf32, #tpu.memory_space<vmem>>, %arg3: memref<1x8xf32, #tpu.memory_space<vmem>>, %arg4: memref<16x8xf32, #tpu.memory_space<vmem>>) attributes {dimension_semantics = [#tpu.dimension_semantics<parallel>], iteration_bounds = array<i64: 2>, scalar_prefetch = 0 : i64, scratch_operands = 0 : i64, tpu.core_type = #tpu.core_type<tc>, window_params = [{transform_indices = @transform_0, window_bounds = array<i64: 16, 32>}, {pipeline_mode = #tpu.pipeline_mode<synchronous>, transform_indices = @transform_1, window_bounds = array<i64: 32, 8>}, {pipeline_mode = #tpu.pipeline_mode<synchronous>, transform_indices = @transform_2, window_bounds = array<i64: 1, 8>}, {transform_indices = @transform_3, window_bounds = array<i64: 16, 8>}]} {
    %c0 = arith.constant 0 : index
    %c0_0 = arith.constant 0 : index
    %0 = vector.load %arg1[%c0, %c0_0] : memref<16x32xf32, #tpu.memory_space<vmem>>, vector<16x32xf32>
    %c0_1 = arith.constant 0 : index
    %c0_2 = arith.constant 0 : index
    %1 = vector.load %arg2[%c0_1, %c0_2] : memref<32x8xf32, #tpu.memory_space<vmem>>, vector<32x8xf32>
    %cst = arith.constant dense<0.000000e+00> : vector<16x8xf32>
    %2 = tpu.matmul %0, %1, %cst {dimension_numbers = #tpu.dot_dimension_numbers<[1], [0], [0], [1], [0, 0, 1, 1], [], []>} : vector<16x32xf32>, vector<32x8xf32>, vector<16x8xf32> -> vector<16x8xf32>
    %c0_3 = arith.constant 0 : index
    %c0_4 = arith.constant 0 : index
    %3 = vector.load %arg3[%c0_3, %c0_4] : memref<1x8xf32, #tpu.memory_space<vmem>>, vector<1x8xf32>
    %4 = vector.broadcast %3 : vector<1x8xf32> to vector<16x8xf32>
    %5 = arith.addf %2, %4 : vector<16x8xf32>
    %6 = tpu.iota {dimensions = array<i32: 1>} : vector<16x8xi32>
    %c4_i32 = arith.constant 4 : i32
    %7 = vector.broadcast %c4_i32 : i32 to vector<16x8xi32>
    %8 = arith.cmpi slt, %6, %7 : vector<16x8xi32>
    %9 = arith.mulf %5, %5 : vector<16x8xf32>
    %cst_5 = arith.constant 0.000000e+00 : f32
    %10 = vector.broadcast %cst_5 : f32 to vector<16x8xf32>
    %11 = arith.select %8, %9, %10 : vector<16x8xi1>, vector<16x8xf32>
    %cst_6 = arith.constant dense<0.000000e+00> : vector<16xf32>
    %12 = vector.multi_reduction <add>, %11, %cst_6 [1] : vector<16x8xf32> to vector<16xf32>
    %13 = vector.shape_cast %12 : vector<16xf32> to vector<16x1xf32>
    %14 = math.sqrt %13 : vector<16x1xf32>
    %cst_7 = arith.constant 9.99999993E-9 : f32
    %15 = vector.broadcast %cst_7 : f32 to vector<16x1xf32>
    %16 = arith.addf %14, %15 : vector<16x1xf32>
    %17 = tpu.reciprocal %16 {approx = true} : vector<16x1xf32> -> vector<16x1xf32>
    %18 = arith.mulf %16, %17 : vector<16x1xf32>
    %cst_8 = arith.constant 2.000000e+00 : f32
    %19 = vector.broadcast %cst_8 : f32 to vector<16x1xf32>
    %20 = arith.subf %19, %18 : vector<16x1xf32>
    %21 = arith.mulf %17, %20 : vector<16x1xf32>
    %cst_9 = arith.constant 1.000000e+00 : f32
    %22 = vector.shape_cast %21 : vector<16x1xf32> to vector<16x1xf32>
    %23 = vector.broadcast %22 : vector<16x1xf32> to vector<16x8xf32>
    %24 = vector.broadcast %cst_9 : f32 to vector<16x8xf32>
    %25 = arith.select %8, %23, %24 : vector<16x8xi1>, vector<16x8xf32>
    %26 = arith.mulf %5, %25 : vector<16x8xf32>
    %c0_10 = arith.constant 0 : index
    %c0_11 = arith.constant 0 : index
    %27 = vector.load %arg4[%c0_10, %c0_11] : memref<16x8xf32, #tpu.memory_space<vmem>>, vector<16x8xf32>
    tpu.vector_store %arg4[%c0_10, %c0_11], %26 {strides = array<i32>} : memref<16x8xf32, #tpu.memory_space<vmem>>, vector<16x8xf32>,
    return
  }
  func.func @transform_0(%arg0: i32) -> (i32, i32) {
    %c0_i32 = arith.constant 0 : i32
    %c0_i32_0 = arith.constant 0 : i32
    return %arg0, %c0_i32 : i32, i32
  }
  func.func @transform_1(%arg0: i32) -> (i32, i32) {
    %c0_i32 = arith.constant 0 : i32
    %c0_i32_0 = arith.constant 0 : i32
    %c0_i32_1 = arith.constant 0 : i32
    return %c0_i32, %c0_i32_0 : i32, i32
  }
  func.func @transform_2(%arg0: i32) -> (i32, i32) {
    %c0_i32 = arith.constant 0 : i32
    %c0_i32_0 = arith.constant 0 : i32
    %c0_i32_1 = arith.constant 0 : i32
    return %c0_i32, %c0_i32_0 : i32, i32
  }
  func.func @transform_3(%arg0: i32) -> (i32, i32) {
    %c0_i32 = arith.constant 0 : i32
    %c0_i32_0 = arith.constant 0 : i32
    return %arg0, %c0_i32 : i32, i32
  }
}

</mosaic_0001>

<bundles_post_ra>
// kernel: tpu_custom_call.1
= control target key start
LH: loop header
LB: loop body
LE: loop exit
PB: predicated region body
PF: predicated region fallthrough
CT: control target
= control target key end

     0   :  { %s452_s12 = smov 0   ;;  %s499_s0 = inlined_call_operand.vmem [shape: f32[32,32], index: 0, kind: input, shape index: {}]   ;;  %s500_s1 = inlined_call_operand.vmem [shape: f32[32,8], index: 1, kind: input, shape index: {}]   ;;  %s501_s2 = inlined_call_operand.vmem [shape: f32[1,8], index: 2, kind: input, shape index: {}]   ;;  %s502_s3 = inlined_call_operand.vmem [shape: f32[32,8], index: 3, kind: output, shape index: {}]  }
   0x1 LB: > { %s369_s13 = sadd.s32 4294967295, %s430_s12   ;;  %p373_p0 = scmp.ge.s32.totalorder %s430_s12, 1  ;;  %s430_s12 = sphi %s452_s12, %s13_s12  }
   0x2   : > { %p138_p1 = scmp.lt.s32.totalorder %s430_s12, 3 }
   0x4   : > { %p139_p2 = pnand %p373_p0, %p138_p1 }
   0x5   : > { %v176_v0 = vld [vmem:[%s500_s1] sm:$0xff] (!%p139_p2)  ;;  %v177_v1 = vld [vmem:[%s500_s1 + $0x8] sm:$0xff] (!%p139_p2)  ;;  %v178_v2 = vld [vmem:[%s500_s1 + $0x10] sm:$0xff] (!%p139_p2)  ;;  %s374_s20 = sshll.u32 (!%p139_p2), %s369_s13, 1  ;;  %vm187_vm0 = vcmask (!%p139_p2), 261120   ;;  %v269_v8 = vlaneseq (!%p139_p2)  ;;  %vm276_vm2 = vcmask (!%p139_p2), 64512  }
   0x6   : > { %142 = sbr.rel (%p139_p2) target bundleno = 421 (0x1a5), region = 32  ;;  %v400_v3 = vpack.c.bf16 (!%p139_p2), %v177_v1, %v176_v0  ;;  %v179_v4 = vld [vmem:[%s500_s1 + $0x18] sm:$0xff] (!%p139_p2)  ;;  %p163_p3 = scmp.lt.s32.totalorder (!%p139_p2), %s374_s20, 3  ;;  %v378_v9 = vld [vmem:[%s501_s2] ss:$0 sm:$0xff] (!%p139_p2) }
   0x7   : > { %v404_v5 = vpack.c.bf16 (!%p139_p2), %v179_v4, %v178_v2  ;;  %v270_v10 = vand.u32 (!%p139_p2), 127, %v269_v8 }
   0x8   : > { %401 = vmatprep.subr.bf16.mxu0 (!%p139_p2), %v400_v3 }
   0x9   : > { %403 = vmatpush3.bf16.msra.mxu0 (!%p139_p2), %v400_v3  ;;  %vm271_vm1 = vcmp.lt.s32.totalorder (!%p139_p2), %v270_v10, 4 }
   0xa   : > { %405 = vmatprep.subr.bf16.mxu0 (!%p139_p2), %v404_v5 }
   0xd   : > { %s504_s20 = smov (!%p163_p3, %s374_s20), 3  ;;  %407 = vmatpush3.bf16.msra.mxu0 %v404_v5 }
   0xe   : > { %s375_s23 = sshll.u32 %s504_s20, 3 }
   0xf   : > { %s166_s26 = scalar_lea.vmem %s499_s0, %s375_s23  ;;  %s172_s4 = scalar_lea.vmem %s502_s3, %s375_s23 }
  0x10   : > { %v174_v6 = vld [vmem:[%s166_s26] sm:$0xff]  ;;  %v175_v7 = vld [vmem:[%s166_s26 + $0x8] sm:$0xff] }
  0x11   : > { %397 = vmatprep.mubr.msk.f32.mxu0 %vm187_vm0, %v174_v6 }
  0x12   : > { %398 = vmatmul.mubr.msk.f32.vlgmr.msra.gmra.mrb[0].mxu0 %vm187_vm0, %v175_v7 }
  0xe5   : > { %v399_v11 = vpop.f32.mrb[0].mxu0 }
  0xe6   : > { %v266_v12 = vadd.f32 %v399_v11, %v378_v9  ;;  %v260_v13 = vpop.f32.mrb[1].mxu0 }
  0xe7   : > { %v261_v14 = vadd.f32 %v378_v9, %v260_v13 }
  0xe8   : > { %v273_v15 = vmul.f32 %v266_v12, %v266_v12 }
  0xe9   : > { %v272_v16 = vmul.f32 %v261_v14, %v261_v14 }
  0xea   : > { %v275_v19 = vsel %vm271_vm1, %v273_v15, 0.0 }
  0xeb   : > { %v274_v17 = vsel %vm271_vm1, %v272_v16, 0.0  ;;  %v280_v20 = vsel %vm276_vm2, %v275_v19, 0.0 }
  0xec   : > { %v277_v18 = vsel %vm276_vm2, %v274_v17, 0.0 }
  0xed   : > { %278 = vadd.xlane.f32.xlu0 %v277_v18 }
  0xf1   : > { %281 = vadd.xlane.f32.xlu0 %v280_v20 }
 0x17a   : > { %v279_v21 = vpop.xlane.xlu0 %278 }
 0x17b   : > { %416 = vrsqrt.f32 %v279_v21  ;;  %vm285_vm3 = vcmp.eq.f32.partialorder %v279_v21, inf  ;;  %v288_v25 = vand.u32 2147483648, %v279_v21  ;;  %vm287_vm4 = vcmp.eq.f32.partialorder %v279_v21, 0.0 }
 0x17e   : > { %v282_v22 = vpop.xlane.xlu0 %281 }
 0x17f   : > { %418 = vrsqrt.f32 %v282_v22  ;;  %vm292_vm5 = vcmp.eq.f32.partialorder %v282_v22, inf  ;;  %v295_v31 = vand.u32 2147483648, %v282_v22  ;;  %vm294_vm6 = vcmp.eq.f32.partialorder %v282_v22, 0.0 }
 0x185   : > { %v417_v23 = vpop.eup %416 }
 0x186   : > { %v284_v24 = vmul.f32 %v417_v23, %v279_v21 }
 0x188   : > { %v286_v26 = vsel %vm285_vm3, %v279_v21, %v284_v24 }
 0x189   : > { %v419_v27 = vpop.eup %418  ;;  %v289_v28 = vsel %vm287_vm4, %v288_v25, %v286_v26 }
 0x18a   : > { %v297_v29 = vadd.f32 1e-08, %v289_v28  ;;  %v291_v30 = vmul.f32 %v419_v27, %v282_v22 }
 0x18c   : > { %420 = vrcp.f32 %v297_v29  ;;  %v293_v32 = vsel %vm292_vm5, %v282_v22, %v291_v30 }
 0x18d   : > { %v296_v33 = vsel %vm294_vm6, %v295_v31, %v293_v32 }
 0x18e   : > { %v298_v34 = vadd.f32 1e-08, %v296_v33 }
 0x190   : > { %422 = vrcp.f32 %v298_v34 }
 0x196   : > { %v421_v35 = vpop.eup %420 }
 0x197   : > { %v301_v36 = vmul.f32 %v421_v35, %v297_v29 }
 0x199   : > { %v303_v37 = vsub.f32 2.0, %v301_v36 }
 0x19a   : > { %v423_v38 = vpop.eup %422 }
 0x19b   : > { %v305_v39 = vmul.f32 %v421_v35, %v303_v37  ;;  %v302_v40 = vmul.f32 %v423_v38, %v298_v34 }
 0x19d   : > { %v307_v41 = vsel %vm271_vm1, %v305_v39, 1.0  ;;  %v304_v42 = vsub.f32 2.0, %v302_v40 }
 0x19e   : > { %v309_v43 = vmul.f32 %v307_v41, %v261_v14 }
 0x19f   : > { %v306_v44 = vmul.f32 %v423_v38, %v304_v42 }
 0x1a0   : > { %311 = vst.msk [vmem:[%s172_s4] sm:$0xff] %vm276_vm2, %v309_v43 }
 0x1a1   : > { %v308_v45 = vsel %vm271_vm1, %v306_v44, 1.0 }
 0x1a2   : > { %v310_v46 = vmul.f32 %v308_v45, %v266_v12 }
 0x1a4   : > { %312 = vst.msk [vmem:[%s172_s4 + $0x8] sm:$0xff] %vm276_vm2, %v310_v46 }
 0x1a5 PF: > { %s13_s12 = sadd.s32 1, %s430_s12  }
 0x1a6   : > { %p10_p4 = scmp.ge.s32.totalorder %s13_s12, 4  }
 0x1a8   :  { %12 = sbr.rel (!%p10_p4) target bundleno = 1 (0x1), region = 62 }

</bundles_post_ra>
